<compile_context>
chip_gen: v7x
topology: tpu7x:2x2x1
jax: 0.10.0
libtpu: 0.0.40
codegen_flags: <defaults>
</compile_context>

<pallas_src>
import functools

import jax
import jax.numpy as jnp
from jax.experimental import pallas as pl
from jax.experimental.pallas import tpu as pltpu


def _round_up(x, m):
    return (x + m - 1) // m * m


def _ffn_kernel(x_ref, gamma_ref, beta_ref, w1_ref, b1_ref, w2_ref, b2_ref, o_ref,
                *, d_in, d_in_p):
    x = x_ref[...].astype(jnp.float32)                 # (tm, d_in_p)
    residual = x

    # --- LayerNorm over the real d_in lanes (eps=1e-6, matching nn.LayerNorm).
    # Padded lanes of x are zero, so the sum over all lanes equals the sum over
    # the real lanes; mask xc so pad lanes don't pollute the variance.
    inv_d = 1.0 / d_in
    mean = jnp.sum(x, axis=-1, keepdims=True) * inv_d
    xc = x - mean
    if d_in_p != d_in:
        lane = jax.lax.broadcasted_iota(jnp.int32, x.shape, dimension=1)
        xc = jnp.where(lane < d_in, xc, 0.0)
    var = jnp.sum(xc * xc, axis=-1, keepdims=True) * inv_d
    inv = jax.lax.rsqrt(var + 1e-6)
    xn = xc * inv * gamma_ref[...] + beta_ref[...]     # pad lanes stay 0 (gamma/beta pads are 0)

    # --- w_1: bf16 MXU matmul, f32 accumulate.
    h = jnp.dot(xn.astype(jnp.bfloat16), w1_ref[...],
                preferred_element_type=jnp.float32) + b1_ref[...]

    # --- exact GELU (erf form), matching F.gelu default.
    h = h * 0.5 * (1.0 + jax.lax.erf(h * 0.7071067811865476))

    # --- w_2: bf16 MXU matmul, f32 accumulate.
    y = jnp.dot(h.astype(jnp.bfloat16), w2_ref[...],
                preferred_element_type=jnp.float32) + b2_ref[...]

    # TODO(synk): dropout is identity (eval-mode semantics); training-mode dropout
    # would use pltpu.prng_seed / pltpu.prng_random_bits to build a keep-mask.
    o_ref[...] = (y + residual).astype(o_ref.dtype)


def position_wise_feed_forward(x, gamma, beta, w1, b1, w2, b2, *, tm=256):
    """Fused FFN. x: [..., d_in]. PyTorch weight layout: w1 [d_hid, d_in], w2 [d_in, d_hid]."""
    orig_shape = x.shape
    d_in = orig_shape[-1]
    d_hid = w1.shape[0]
    x2d = x.reshape(-1, d_in)
    n = x2d.shape[0]

    # Lane-pad feature dims to multiples of 128 (dense vld/vst, MXU-aligned K/N).
    d_in_p = _round_up(d_in, 128)
    d_hid_p = _round_up(d_hid, 128)

    # Row tile: multiple of 8 (16 if bf16 I/O), capped at the (padded) row count.
    row_align = 16 if x.dtype == jnp.bfloat16 else 8
    tm_eff = max(row_align, _round_up(min(tm, n), row_align))
    n_p = _round_up(n, tm_eff)

    f32, bf16 = jnp.float32, jnp.bfloat16

    # Zero padding keeps the math exact (pad weight rows/cols and bias lanes are 0).
    xp = jnp.zeros((n_p, d_in_p), x.dtype).at[:n, :d_in].set(x2d)
    gp = jnp.zeros((1, d_in_p), f32).at[0, :d_in].set(gamma.astype(f32))
    bp = jnp.zeros((1, d_in_p), f32).at[0, :d_in].set(beta.astype(f32))
    w1p = jnp.zeros((d_in_p, d_hid_p), bf16).at[:d_in, :d_hid].set(w1.T.astype(bf16))
    b1p = jnp.zeros((1, d_hid_p), f32).at[0, :d_hid].set(b1.astype(f32))
    w2p = jnp.zeros((d_hid_p, d_in_p), bf16).at[:d_hid, :d_in].set(w2.T.astype(bf16))
    b2p = jnp.zeros((1, d_in_p), f32).at[0, :d_in].set(b2.astype(f32))

    kernel = functools.partial(_ffn_kernel, d_in=d_in, d_in_p=d_in_p)

    itemsize = jnp.dtype(x.dtype).itemsize
    cost = pl.CostEstimate(
        flops=int(4 * n_p * d_in_p * d_hid_p),                    # two matmuls
        transcendentals=int(n_p * d_hid_p),                       # erf
        bytes_accessed=int(2 * n_p * d_in_p * itemsize            # x in + out
                           + 2 * d_in_p * d_hid_p * 2             # bf16 weights
                           + (3 * d_in_p + d_hid_p) * 4),         # gamma/beta/biases
    )

    # NOTE: the weight/bias index_maps are constant; on v7x (64 MiB VMEM) with
    # large d_in/d_hid, consider pipeline_mode=pl.Buffered(1) on those specs (or
    # tiling d_hid with an 'arbitrary' grid axis) to avoid double-buffering
    # grid-invariant operands.
    out = pl.pallas_call(
        kernel,
        out_shape=jax.ShapeDtypeStruct((n_p, d_in_p), x.dtype),
        grid_spec=pltpu.PrefetchScalarGridSpec(
            num_scalar_prefetch=0,
            grid=(n_p // tm_eff,),
            in_specs=[
                pl.BlockSpec((tm_eff, d_in_p), lambda i: (i, 0)),   # x rows
                pl.BlockSpec((1, d_in_p), lambda i: (0, 0)),        # gamma
                pl.BlockSpec((1, d_in_p), lambda i: (0, 0)),        # beta
                pl.BlockSpec((d_in_p, d_hid_p), lambda i: (0, 0)),  # W1^T (bf16)
                pl.BlockSpec((1, d_hid_p), lambda i: (0, 0)),       # b1
                pl.BlockSpec((d_hid_p, d_in_p), lambda i: (0, 0)),  # W2^T (bf16)
                pl.BlockSpec((1, d_in_p), lambda i: (0, 0)),        # b2
            ],
            out_specs=pl.BlockSpec((tm_eff, d_in_p), lambda i: (i, 0)),
        ),
        compiler_params=pltpu.CompilerParams(
            dimension_semantics=("parallel",),
            vmem_limit_bytes=64 << 20),
        cost_estimate=cost,
    )(xp, gp, bp, w1p, b1p, w2p, b2p)

    return out[:n, :d_in].reshape(orig_shape)


if __name__ == "__main__":
    # Small shapes implied by the module: tokens [B, S, d_in], hidden d_hid.
    B, S, d_in, d_hid = 2, 8, 32, 64

    key = jax.random.PRNGKey(0)
    kx, kw1, kb1, kw2, kb2 = jax.random.split(key, 5)

    x = jax.random.normal(kx, (B, S, d_in), dtype=jnp.float32)

    # Deterministic parameter init (PyTorch Linear-style uniform bounds).
    lim1 = 1.0 / (d_in ** 0.5)
    lim2 = 1.0 / (d_hid ** 0.5)
    w1 = jax.random.uniform(kw1, (d_hid, d_in), minval=-lim1, maxval=lim1)   # nn.Linear(d_in, d_hid).weight
    b1 = jax.random.uniform(kb1, (d_hid,), minval=-lim1, maxval=lim1)
    w2 = jax.random.uniform(kw2, (d_in, d_hid), minval=-lim2, maxval=lim2)   # nn.Linear(d_hid, d_in).weight
    b2 = jax.random.uniform(kb2, (d_in,), minval=-lim2, maxval=lim2)
    gamma = jnp.ones((d_in,), jnp.float32)   # nn.LayerNorm default weight
    beta = jnp.zeros((d_in,), jnp.float32)   # nn.LayerNorm default bias

    out = position_wise_feed_forward(x, gamma, beta, w1, b1, w2, b2, tm=256)
    out = jax.block_until_ready(out)

    # Reference in plain f32 JAX (eval-mode dropout = identity). Kernel matmuls
    # run in bf16 on the MXU, so compare with a bf16-appropriate tolerance.
    xf = x.reshape(-1, d_in)
    mu = xf.mean(-1, keepdims=True)
    var = ((xf - mu) ** 2).mean(-1, keepdims=True)
    xn = (xf - mu) / jnp.sqrt(var + 1e-6) * gamma + beta
    h = xn @ w1.T + b1
    h = h * 0.5 * (1.0 + jax.lax.erf(h / jnp.sqrt(2.0)))
    ref = (h @ w2.T + b2 + xf).reshape(B, S, d_in)

    assert out.shape == x.shape and out.dtype == x.dtype
    assert jnp.allclose(out, ref, atol=2e-2, rtol=2e-2), "mismatch vs reference"

    print("KERNEL_OK")
</pallas_src>

<mosaic_0001>
module attributes {stable_mosaic.version = 11 : i64} {
  func.func @_ffn_kernel(%arg0: i32, %arg1: memref<16x128xf32, #tpu.memory_space<vmem>>, %arg2: memref<1x128xf32, #tpu.memory_space<vmem>>, %arg3: memref<1x128xf32, #tpu.memory_space<vmem>>, %arg4: memref<128x128xbf16, #tpu.memory_space<vmem>>, %arg5: memref<1x128xf32, #tpu.memory_space<vmem>>, %arg6: memref<128x128xbf16, #tpu.memory_space<vmem>>, %arg7: memref<1x128xf32, #tpu.memory_space<vmem>>, %arg8: memref<16x128xf32, #tpu.memory_space<vmem>>) attributes {dimension_semantics = [#tpu.dimension_semantics<parallel>], iteration_bounds = array<i64: 1>, scalar_prefetch = 0 : i64, scratch_operands = 0 : i64, tpu.core_type = #tpu.core_type<tc>, window_params = [{transform_indices = @transform_0, window_bounds = array<i64: 16, 128>}, {pipeline_mode = #tpu.pipeline_mode<synchronous>, transform_indices = @transform_1, window_bounds = array<i64: 1, 128>}, {pipeline_mode = #tpu.pipeline_mode<synchronous>, transform_indices = @transform_2, window_bounds = array<i64: 1, 128>}, {pipeline_mode = #tpu.pipeline_mode<synchronous>, transform_indices = @transform_3, window_bounds = array<i64: 128, 128>}, {pipeline_mode = #tpu.pipeline_mode<synchronous>, transform_indices = @transform_4, window_bounds = array<i64: 1, 128>}, {pipeline_mode = #tpu.pipeline_mode<synchronous>, transform_indices = @transform_5, window_bounds = array<i64: 128, 128>}, {pipeline_mode = #tpu.pipeline_mode<synchronous>, transform_indices = @transform_6, window_bounds = array<i64: 1, 128>}, {transform_indices = @transform_7, window_bounds = array<i64: 16, 128>}]} {
    %c0 = arith.constant 0 : index
    %c0_0 = arith.constant 0 : index
    %0 = vector.load %arg1[%c0, %c0_0] : memref<16x128xf32, #tpu.memory_space<vmem>>, vector<16x128xf32>
    %cst = arith.constant dense<0.000000e+00> : vector<16xf32>
    %1 = vector.multi_reduction <add>, %0, %cst [1] : vector<16x128xf32> to vector<16xf32>
    %2 = vector.shape_cast %1 : vector<16xf32> to vector<16x1xf32>
    %cst_1 = arith.constant 3.125000e-02 : f32
    %3 = vector.broadcast %cst_1 : f32 to vector<16x1xf32>
    %4 = arith.mulf %2, %3 : vector<16x1xf32>
    %5 = vector.broadcast %4 : vector<16x1xf32> to vector<16x128xf32>
    %6 = arith.subf %0, %5 : vector<16x128xf32>
    %7 = tpu.iota {dimensions = array<i32: 1>} : vector<16x128xi32>
    %c32_i32 = arith.constant 32 : i32
    %8 = vector.broadcast %c32_i32 : i32 to vector<16x128xi32>
    %9 = arith.cmpi slt, %7, %8 : vector<16x128xi32>
    %cst_2 = arith.constant 0.000000e+00 : f32
    %10 = vector.broadcast %cst_2 : f32 to vector<16x128xf32>
    %11 = arith.select %9, %6, %10 : vector<16x128xi1>, vector<16x128xf32>
    %12 = arith.mulf %11, %11 : vector<16x128xf32>
    %cst_3 = arith.constant dense<0.000000e+00> : vector<16xf32>
    %13 = vector.multi_reduction <add>, %12, %cst_3 [1] : vector<16x128xf32> to vector<16xf32>
    %14 = vector.shape_cast %13 : vector<16xf32> to vector<16x1xf32>
    %cst_4 = arith.constant 3.125000e-02 : f32
    %15 = vector.broadcast %cst_4 : f32 to vector<16x1xf32>
    %16 = arith.mulf %14, %15 : vector<16x1xf32>
    %cst_5 = arith.constant 9.99999997E-7 : f32
    %17 = vector.broadcast %cst_5 : f32 to vector<16x1xf32>
    %18 = arith.addf %16, %17 : vector<16x1xf32>
    %19 = math.rsqrt %18 : vector<16x1xf32>
    %20 = vector.broadcast %19 : vector<16x1xf32> to vector<16x128xf32>
    %21 = arith.mulf %11, %20 : vector<16x128xf32>
    %c0_6 = arith.constant 0 : index
    %c0_7 = arith.constant 0 : index
    %22 = vector.load %arg2[%c0_6, %c0_7] : memref<1x128xf32, #tpu.memory_space<vmem>>, vector<1x128xf32>
    %23 = vector.broadcast %22 : vector<1x128xf32> to vector<16x128xf32>
    %24 = arith.mulf %21, %23 : vector<16x128xf32>
    %c0_8 = arith.constant 0 : index
    %c0_9 = arith.constant 0 : index
    %25 = vector.load %arg3[%c0_8, %c0_9] : memref<1x128xf32, #tpu.memory_space<vmem>>, vector<1x128xf32>
    %26 = vector.broadcast %25 : vector<1x128xf32> to vector<16x128xf32>
    %27 = arith.addf %24, %26 : vector<16x128xf32>
    %28 = arith.truncf %27 : vector<16x128xf32> to vector<16x128xbf16>
    %c0_10 = arith.constant 0 : index
    %c0_11 = arith.constant 0 : index
    %29 = vector.load %arg4[%c0_10, %c0_11] : memref<128x128xbf16, #tpu.memory_space<vmem>>, vector<128x128xbf16>
    %cst_12 = arith.constant dense<0.000000e+00> : vector<16x128xf32>
    %30 = tpu.matmul %28, %29, %cst_12 {dimension_numbers = #tpu.dot_dimension_numbers<[1], [0], [0], [1], [0, 0, 1, 1], [], []>} : vector<16x128xbf16>, vector<128x128xbf16>, vector<16x128xf32> -> vector<16x128xf32>
    %c0_13 = arith.constant 0 : index
    %c0_14 = arith.constant 0 : index
    %31 = vector.load %arg5[%c0_13, %c0_14] : memref<1x128xf32, #tpu.memory_space<vmem>>, vector<1x128xf32>
    %32 = vector.broadcast %31 : vector<1x128xf32> to vector<16x128xf32>
    %33 = arith.addf %30, %32 : vector<16x128xf32>
    %cst_15 = arith.constant 5.000000e-01 : f32
    %34 = vector.broadcast %cst_15 : f32 to vector<16x128xf32>
    %35 = arith.mulf %33, %34 : vector<16x128xf32>
    %cst_16 = arith.constant 0.707106769 : f32
    %36 = vector.broadcast %cst_16 : f32 to vector<16x128xf32>
    %37 = arith.mulf %33, %36 : vector<16x128xf32>
    %38 = math.erf %37 : vector<16x128xf32>
    %cst_17 = arith.constant 1.000000e+00 : f32
    %39 = vector.broadcast %cst_17 : f32 to vector<16x128xf32>
    %40 = arith.addf %39, %38 : vector<16x128xf32>
    %41 = arith.mulf %35, %40 : vector<16x128xf32>
    %42 = arith.truncf %41 : vector<16x128xf32> to vector<16x128xbf16>
    %c0_18 = arith.constant 0 : index
    %c0_19 = arith.constant 0 : index
    %43 = vector.load %arg6[%c0_18, %c0_19] : memref<128x128xbf16, #tpu.memory_space<vmem>>, vector<128x128xbf16>
    %cst_20 = arith.constant dense<0.000000e+00> : vector<16x128xf32>
    %44 = tpu.matmul %42, %43, %cst_20 {dimension_numbers = #tpu.dot_dimension_numbers<[1], [0], [0], [1], [0, 0, 1, 1], [], []>} : vector<16x128xbf16>, vector<128x128xbf16>, vector<16x128xf32> -> vector<16x128xf32>
    %c0_21 = arith.constant 0 : index
    %c0_22 = arith.constant 0 : index
    %45 = vector.load %arg7[%c0_21, %c0_22] : memref<1x128xf32, #tpu.memory_space<vmem>>, vector<1x128xf32>
    %46 = vector.broadcast %45 : vector<1x128xf32> to vector<16x128xf32>
    %47 = arith.addf %44, %46 : vector<16x128xf32>
    %48 = arith.addf %47, %0 : vector<16x128xf32>
    %c0_23 = arith.constant 0 : index
    %c0_24 = arith.constant 0 : index
    %49 = vector.load %arg8[%c0_23, %c0_24] : memref<16x128xf32, #tpu.memory_space<vmem>>, vector<16x128xf32>
    tpu.vector_store %arg8[%c0_23, %c0_24], %48 {strides = array<i32>} : memref<16x128xf32, #tpu.memory_space<vmem>>, vector<16x128xf32>,
    return
  }
  func.func @transform_0(%arg0: i32) -> (i32, i32) {
    %c0_i32 = arith.constant 0 : i32
    %c0_i32_0 = arith.constant 0 : i32
    return %arg0, %c0_i32 : i32, i32
  }
  func.func @transform_1(%arg0: i32) -> (i32, i32) {
    %c0_i32 = arith.constant 0 : i32
    %c0_i32_0 = arith.constant 0 : i32
    %c0_i32_1 = arith.constant 0 : i32
    return %c0_i32, %c0_i32_0 : i32, i32
  }
  func.func @transform_2(%arg0: i32) -> (i32, i32) {
    %c0_i32 = arith.constant 0 : i32
    %c0_i32_0 = arith.constant 0 : i32
    %c0_i32_1 = arith.constant 0 : i32
    return %c0_i32, %c0_i32_0 : i32, i32
  }
  func.func @transform_3(%arg0: i32) -> (i32, i32) {
    %c0_i32 = arith.constant 0 : i32
    %c0_i32_0 = arith.constant 0 : i32
    %c0_i32_1 = arith.constant 0 : i32
    return %c0_i32, %c0_i32_0 : i32, i32
  }
  func.func @transform_4(%arg0: i32) -> (i32, i32) {
    %c0_i32 = arith.constant 0 : i32
    %c0_i32_0 = arith.constant 0 : i32
    %c0_i32_1 = arith.constant 0 : i32
    return %c0_i32, %c0_i32_0 : i32, i32
  }
  func.func @transform_5(%arg0: i32) -> (i32, i32) {
    %c0_i32 = arith.constant 0 : i32
    %c0_i32_0 = arith.constant 0 : i32
    %c0_i32_1 = arith.constant 0 : i32
    return %c0_i32, %c0_i32_0 : i32, i32
  }
  func.func @transform_6(%arg0: i32) -> (i32, i32) {
    %c0_i32 = arith.constant 0 : i32
    %c0_i32_0 = arith.constant 0 : i32
    %c0_i32_1 = arith.constant 0 : i32
    return %c0_i32, %c0_i32_0 : i32, i32
  }
  func.func @transform_7(%arg0: i32) -> (i32, i32) {
    %c0_i32 = arith.constant 0 : i32
    %c0_i32_0 = arith.constant 0 : i32
    return %arg0, %c0_i32 : i32, i32
  }
}

</mosaic_0001>

<bundles_post_ra>
// kernel: tpu_custom_call.1
= control target key start
LH: loop header
LB: loop body
LE: loop exit
PB: predicated region body
PF: predicated region fallthrough
CT: control target
= control target key end

     0   :  { %12 = vsyncpa [#allocation3], 0  ;;  %s922_s0 = inlined_call_operand.hbm [shape: f32[16,128], index: 0, kind: input, shape index: {}]   ;;  %s923_s1 = inlined_call_operand.hbm [shape: f32[1,128], index: 1, kind: input, shape index: {}]   ;;  %s924_s2 = inlined_call_operand.hbm [shape: f32[1,128], index: 2, kind: input, shape index: {}]   ;;  %s925_s3 = inlined_call_operand.hbm [shape: bf16[128,128], index: 3, kind: input, shape index: {}]   ;;  %s926_s4 = inlined_call_operand.hbm [shape: f32[1,128], index: 4, kind: input, shape index: {}]   ;;  %s927_s5 = inlined_call_operand.hbm [shape: bf16[128,128], index: 5, kind: input, shape index: {}]   ;;  %s928_s6 = inlined_call_operand.hbm [shape: f32[1,128], index: 6, kind: input, shape index: {}]   ;;  %s929_s7 = inlined_call_operand.hbm [shape: f32[16,128], index: 7, kind: output, shape index: {}]  }
   0x1   :  { %13 = vsyncpa [#allocation6], 0 }
   0x2   :  { %14 = vsyncpa [#allocation9], 0 }
   0x3   :  { %15 = vsyncpa [#allocation12], 0 }
   0x4   :  { %16 = vsyncpa [#allocation4], 0  ;;  %s724_s24 = smov [#allocation5]   ;;  %s725_s26 = smov [#allocation8]  }
   0x5   :  { %s35_s25 = sshll.u32 %s724_s24, 4  ;;  %s54_s27 = sshll.u32 %s725_s26, 4  ;;  %s36_s25 = int_to_ptr.vmem [resolvable:$true] %s35_s25  ;;  %s778_s27 = int_to_ptr.vmem [resolvable:$true] %s54_s27 }
   0x6   :  { %s538_s30 = scalar_lea.hbm %s923_s1, 16 }
   0x7   :  { %p539_p0 = scmp.ne.s32.totalorder %s923_s1, %s538_s30  ;;  %p542_p1 = scmp.lt.u32.totalorder %s538_s30, %s923_s1 }
   0x9   :  { %p544_p2 = pnand %p542_p1, %p539_p0 }
   0xb   :  { %547 = shalt.err (!%p544_p2)
}
   0xc   :  { %s548_s12 = scalar_lea.vmem %s36_s25, 16  ;;  %s552_s13 = scalar_lea.vmem %s36_s25, 32 }
   0xd   :  { %p549_p3 = scmp.ne.s32.totalorder %s36_s25, %s548_s12  ;;  %p553_p4 = scmp.lt.s32.totalorder %s36_s25, %s36_s25 }
   0xe   :  { %p554_p5 = scmp.lt.s32.totalorder %s552_s13, %s548_s12 }
  0x10   :  { %p555_p6 = por %p554_p5, %p553_p4 }
  0x12   :  { %p556_p7 = pnand %p555_p6, %p549_p3 }
  0x14   :  { %559 = shalt.err (!%p556_p7)
}
  0x15   :  { %38 = dma.hbm_to_vmem [thread:$0]  %s923_s1, 16, %s36_s25, [#allocation6]  }
  0x16   :  { %s560_s18 = scalar_lea.hbm %s925_s3, 1024 }
  0x17   :  { %p561_p8 = scmp.ne.s32.totalorder %s925_s3, %s560_s18  ;;  %p564_p9 = scmp.lt.u32.totalorder %s560_s18, %s925_s3 }
  0x19   :  { %p566_p10 = pnand %p564_p9, %p561_p8 }
  0x1b   :  { %569 = shalt.err (!%p566_p10)
}
  0x1c   :  { %s570_s23 = scalar_lea.vmem %s778_s27, 1024  ;;  %p575_p12 = scmp.lt.s32.totalorder %s778_s27, %s778_s27 }
  0x1d   :  { %p571_p11 = scmp.ne.s32.totalorder %s778_s27, %s570_s23  ;;  %p576_p13 = scmp.lt.s32.totalorder %s570_s23, %s570_s23 }
  0x1f   :  { %p577_p0 = por %p576_p13, %p575_p12 }
  0x21   :  { %p578_p1 = pnand %p577_p0, %p571_p11 }
  0x23   :  { %581 = shalt.err (!%p578_p1)
}
  0x24   :  { %s726_s1 = smov 64   ;;  %s727_s24 = smov 4  }
  0x25   :  { %60 = dma.hbm_to_vmem [thread:$0]  %s925_s3, 1024, %s778_s27, [#allocation9], %s726_s1, %s726_s1, %s727_s24  }
  0x26   :  { %s728_s28 = smov [#allocation11]   ;;  %s729_s30 = smov [#allocation2]  }
  0x27   :  { %s76_s29 = sshll.u32 %s728_s28, 4  ;;  %s22_s8 = sshll.u32 %s729_s30, 4  ;;  %s77_s29 = int_to_ptr.vmem [resolvable:$true] %s76_s29  ;;  %s809_s8 = int_to_ptr.vmem [resolvable:$true] %s22_s8 }
  0x28   :  { %s582_s11 = scalar_lea.hbm %s927_s5, 1024 }
  0x29   :  { %p583_p2 = scmp.ne.s32.totalorder %s927_s5, %s582_s11  ;;  %p586_p3 = scmp.lt.u32.totalorder %s582_s11, %s927_s5 }
  0x2b   :  { %p588_p4 = pnand %p586_p3, %p583_p2 }
  0x2d   :  { %591 = shalt.err (!%p588_p4)
}
  0x2e   :  { %s592_s3 = scalar_lea.vmem %s77_s29, 1024  ;;  %p597_p6 = scmp.lt.s32.totalorder %s77_s29, %s77_s29 }
  0x2f   :  { %p593_p5 = scmp.ne.s32.totalorder %s77_s29, %s592_s3  ;;  %p598_p7 = scmp.lt.s32.totalorder %s592_s3, %s592_s3 }
  0x31   :  { %p599_p8 = por %p598_p7, %p597_p6 }
  0x33   :  { %p600_p9 = pnand %p599_p8, %p593_p5 }
  0x35   :  { %603 = shalt.err (!%p600_p9)
}
  0x36   :  { %82 = dma.hbm_to_vmem [thread:$0]  %s927_s5, 1024, %s77_s29, [#allocation12], %s726_s1, %s726_s1, %s727_s24  }
  0x37   :  { %s604_s19 = scalar_lea.hbm %s922_s0, 256 }
  0x38   :  { %p605_p10 = scmp.ne.s32.totalorder %s922_s0, %s604_s19  ;;  %p608_p11 = scmp.lt.u32.totalorder %s604_s19, %s922_s0 }
  0x3a   :  { %p610_p12 = pnand %p608_p11, %p605_p10 }
  0x3c   :  { %613 = shalt.err (!%p610_p12)
}
  0x3d   :  { %s614_s25 = scalar_lea.vmem %s809_s8, 256  ;;  %p619_p0 = scmp.lt.s32.totalorder %s809_s8, %s809_s8 }
  0x3e   :  { %p615_p13 = scmp.ne.s32.totalorder %s809_s8, %s614_s25  ;;  %p620_p1 = scmp.lt.s32.totalorder %s614_s25, %s614_s25 }
  0x40   :  { %p621_p2 = por %p620_p1, %p619_p0 }
  0x42   :  { %p622_p3 = pnand %p621_p2, %p615_p13 }
  0x44   :  { %625 = shalt.err (!%p622_p3)
}
  0x45   :  { %s730_s5 = smov 128   ;;  %s731_s1 = smov 8  }
  0x46   :  { %28 = dma.hbm_to_vmem [thread:$0]  %s922_s0, 256, %s809_s8, [#allocation3], %s730_s5, %s730_s5, %s731_s1  }
  0x47   :  { %s732_s28 = smov [#allocation7]   ;;  %s733_s30 = smov [#allocation10]  }
  0x48   :  { %s45_s29 = sshll.u32 %s732_s28, 4  ;;  %s67_s9 = sshll.u32 %s733_s30, 4  ;;  %s46_s29 = int_to_ptr.vmem [resolvable:$true] %s45_s29  ;;  %s68_s9 = int_to_ptr.vmem [resolvable:$true] %s67_s9 }
  0x49   :  { %s626_s12 = scalar_lea.hbm %s924_s2, 16 }
  0x4a   :  { %p627_p4 = scmp.ne.s32.totalorder %s924_s2, %s626_s12  ;;  %p630_p5 = scmp.lt.u32.totalorder %s626_s12, %s924_s2 }
  0x4c   :  { %p632_p6 = pnand %p630_p5, %p627_p4 }
  0x4e   :  { %635 = shalt.err (!%p632_p6)
}
  0x4f   :  { %s636_s0 = scalar_lea.vmem %s46_s29, 16  ;;  %s640_s8 = scalar_lea.vmem %s46_s29, 32 }
  0x50   :  { %p637_p7 = scmp.ne.s32.totalorder %s46_s29, %s636_s0  ;;  %p641_p8 = scmp.lt.s32.totalorder %s46_s29, %s46_s29 }
  0x51   :  { %p642_p9 = scmp.lt.s32.totalorder %s640_s8, %s636_s0 }
  0x53   :  { %p643_p10 = por %p642_p9, %p641_p8 }
  0x55   :  { %p644_p11 = pnand %p643_p10, %p637_p7 }
  0x57   :  { %647 = shalt.err (!%p644_p11)
}
  0x58   :  { %48 = dma.hbm_to_vmem [thread:$0]  %s924_s2, 16, %s46_s29, [#allocation6]  }
  0x59   :  { %s648_s19 = scalar_lea.hbm %s926_s4, 16 }
  0x5a   :  { %p649_p12 = scmp.ne.s32.totalorder %s926_s4, %s648_s19  ;;  %p652_p13 = scmp.lt.u32.totalorder %s648_s19, %s926_s4 }
  0x5c   :  { %p654_p0 = pnand %p652_p13, %p649_p12 }
  0x5e   :  { %657 = shalt.err (!%p654_p0)
}
  0x5f   :  { %s658_s25 = scalar_lea.vmem %s68_s9, 16  ;;  %s662_s24 = scalar_lea.vmem %s68_s9, 32 }
  0x60   :  { %p659_p1 = scmp.ne.s32.totalorder %s68_s9, %s658_s25  ;;  %p663_p2 = scmp.lt.s32.totalorder %s68_s9, %s68_s9 }
  0x61   :  { %p664_p3 = scmp.lt.s32.totalorder %s662_s24, %s658_s25 }
  0x63   :  { %p665_p4 = por %p664_p3, %p663_p2 }
  0x65   :  { %p666_p5 = pnand %p665_p4, %p659_p1 }
  0x67   :  { %669 = shalt.err (!%p666_p5)
}
  0x68   :  { %70 = dma.hbm_to_vmem [thread:$0]  %s926_s4, 16, %s68_s9, [#allocation9]  }
  0x69   :  { %s734_s28 = smov [#allocation13]   ;;  %s670_s11 = scalar_lea.hbm %s928_s6, 16 }
  0x6a   :  { %s89_s29 = sshll.u32 %s734_s28, 4  ;;  %p671_p6 = scmp.ne.s32.totalorder %s928_s6, %s670_s11  ;;  %s90_s29 = int_to_ptr.vmem [resolvable:$true] %s89_s29 }
  0x6b   :  { %p674_p7 = scmp.lt.u32.totalorder %s670_s11, %s928_s6 }
  0x6d   :  { %p676_p8 = pnand %p674_p7, %p671_p6 }
  0x6f   :  { %679 = shalt.err (!%p676_p8)
}
  0x70   :  { %s680_s3 = scalar_lea.vmem %s90_s29, 16  ;;  %s684_s4 = scalar_lea.vmem %s90_s29, 32 }
  0x71   :  { %p681_p9 = scmp.ne.s32.totalorder %s90_s29, %s680_s3  ;;  %p685_p10 = scmp.lt.s32.totalorder %s90_s29, %s90_s29 }
  0x72   :  { %p686_p11 = scmp.lt.s32.totalorder %s684_s4, %s680_s3 }
  0x74   :  { %p687_p12 = por %p686_p11, %p685_p10 }
  0x76   :  { %p688_p13 = pnand %p687_p12, %p681_p9 }
  0x78   :  { %691 = shalt.err (!%p688_p13)
}
  0x79   :  { %92 = dma.hbm_to_vmem [thread:$0]  %s928_s6, 16, %s90_s29, [#allocation12]  }
  0x7a   :  { %714 = dma.done.wait [#allocation3], 256  }
  0x7b   :  { %715 = vsyncadd [#allocation3], 4294967040 }
  0x7c   :  { %716 = dma.done.wait [#allocation6], 32  }
  0x7d   :  { %717 = vsyncadd [#allocation6], 4294967264 }
  0x7e   :  { %718 = dma.done.wait [#allocation9], 1040  }
  0x7f   :  { %719 = vsyncadd [#allocation9], 4294966256 }
  0x80   :  { %720 = dma.done.wait [#allocation12], 1040  }
  0x81   :  { %721 = vsyncadd [#allocation12], 4294966256  ;;  %v879_v0 = vld [vmem:[#allocation2] sm:$0xff]  ;;  %v881_v1 = vld [vmem:[#allocation2 + $0x8] sm:$0xff]  ;;  %v735_v3 = vmov 0.0   ;;  %v125_v4 = vlaneseq  ;;  %vm736_vm1 = vmmov 0  }
  0x82   :  { %117 = vadd.xlane.f32.xlu0 %v879_v0  ;;  %v514_v2 = vld [vmem:[#allocation8] sm:$0xff]   ;;  %460 = vmatprep.subr.bf16.mxu0 %v735_v3  ;;  %v515_v16 = vld [vmem:[#allocation8 + $0x8] sm:$0xff]   ;;  %v516_v17 = vld [vmem:[#allocation8 + $0x10] sm:$0xff]   ;;  %s737_s6 = smov [#allocation14]  }
  0x83   :  { %480 = vmatprep.subr.bf16.mxu1 %v735_v3  ;;  %461 = vmatpush3.bf16.msra.mxu0 %v514_v2  ;;  %v126_v5 = vand.u32 127, %v125_v4  ;;  %v517_v18 = vld [vmem:[#allocation8 + $0x18] sm:$0xff]   ;;  %v518_v19 = vld [vmem:[#allocation8 + $0x20] sm:$0xff]   ;;  %v519_v20 = vld [vmem:[#allocation8 + $0x28] sm:$0xff]   ;;  %s407_s8 = sshll.u32 %s737_s6, 4  ;;  %s408_s8 = int_to_ptr.vmem [resolvable:$true] %s407_s8 }
  0x84   :  { %462 = vmatprep.subr.bf16.mxu0 %v735_v3  ;;  %476 = vmatprep.mubr.msk.bf16.mxu0 %vm736_vm1, %v735_v3  ;;  %v520_v21 = vld [vmem:[#allocation8 + $0x30] sm:$0xff]   ;;  %v521_v22 = vld [vmem:[#allocation8 + $0x38] sm:$0xff]   ;;  %v522_v23 = vld [vmem:[#allocation11] sm:$0xff]   ;;  %s692_s27 = scalar_lea.vmem %s408_s8, 256  ;;  %p697_p1 = scmp.lt.s32.totalorder %s408_s8, %s408_s8 }
  0x85   :  { %vm127_vm0 = vcmp.lt.s32.totalorder %v126_v5, 32  ;;  %496 = vmatprep.mubr.msk.bf16.mxu1 %vm736_vm1, %v735_v3  ;;  %481 = vmatpush3.bf16.msra.mxu1 %v522_v23  ;;  %v523_v24 = vld [vmem:[#allocation11 + $0x8] sm:$0xff]   ;;  %v422_v33 = vld [vmem:[#allocation5] ss:$0 sm:$0xff]  ;;  %v423_v37 = vld [vmem:[#allocation7] ss:$0 sm:$0xff]  ;;  %p693_p0 = scmp.ne.s32.totalorder %s408_s8, %s692_s27  ;;  %p698_p2 = scmp.lt.s32.totalorder %s692_s27, %s692_s27 }
  0x86   :  { %119 = vadd.xlane.f32.xlu0 %v881_v1  ;;  %482 = vmatprep.subr.bf16.mxu1 %v735_v3  ;;  %v524_v42 = vld [vmem:[#allocation11 + $0x10] sm:$0xff]   ;;  %v525_v43 = vld [vmem:[#allocation11 + $0x18] sm:$0xff]   ;;  %v526_v44 = vld [vmem:[#allocation11 + $0x20] sm:$0xff]  }
  0x87   :  { %463 = vmatpush3.bf16.msra.mxu0 %v515_v16  ;;  %v527_v45 = vld [vmem:[#allocation11 + $0x28] sm:$0xff]   ;;  %v528_v46 = vld [vmem:[#allocation11 + $0x30] sm:$0xff]   ;;  %v529_v47 = vld [vmem:[#allocation11 + $0x38] sm:$0xff]   ;;  %p699_p3 = por %p698_p2, %p697_p1 }
  0x88   :  { %464 = vmatprep.subr.bf16.mxu0 %v735_v3  ;;  %v424_v48 = vld [vmem:[#allocation10] ss:$0 sm:$0xff]  ;;  %v433_v4 = vld [vmem:[#allocation13] ss:$0 sm:$0xff] }
  0x89   :  { %483 = vmatpush3.bf16.msra.mxu1 %v523_v24  ;;  %p700_p4 = pnand %p699_p3, %p693_p0 }
  0x8a   :  { %484 = vmatprep.subr.bf16.mxu1 %v735_v3 }
  0x8b   :  { %465 = vmatpush3.bf16.msra.mxu0 %v516_v17 }
  0x8c   :  { %466 = vmatprep.subr.bf16.mxu0 %v735_v3 }
  0x8d   :  { %485 = vmatpush3.bf16.msra.mxu1 %v524_v42 }
  0x8e   :  { %486 = vmatprep.subr.bf16.mxu1 %v735_v3 }
  0x8f   :  { %467 = vmatpush3.bf16.msra.mxu0 %v517_v18 }
  0x90   :  { %468 = vmatprep.subr.bf16.mxu0 %v735_v3 }
  0x91   :  { %487 = vmatpush3.bf16.msra.mxu1 %v525_v43 }
  0x92   :  { %488 = vmatprep.subr.bf16.mxu1 %v735_v3 }
  0x93   :  { %469 = vmatpush3.bf16.msra.mxu0 %v518_v19 }
  0x94   :  { %470 = vmatprep.subr.bf16.mxu0 %v735_v3 }
  0x95   :  { %489 = vmatpush3.bf16.msra.mxu1 %v526_v44 }
  0x96   :  { %490 = vmatprep.subr.bf16.mxu1 %v735_v3 }
  0x97   :  { %471 = vmatpush3.bf16.msra.mxu0 %v519_v20 }
  0x98   :  { %472 = vmatprep.subr.bf16.mxu0 %v735_v3 }
  0x99   :  { %491 = vmatpush3.bf16.msra.mxu1 %v527_v45 }
  0x9a   :  { %492 = vmatprep.subr.bf16.mxu1 %v735_v3 }
  0x9b   :  { %473 = vmatpush3.bf16.msra.mxu0 %v520_v21 }
  0x9c   :  { %474 = vmatprep.subr.bf16.mxu0 %v735_v3 }
  0x9d   :  { %493 = vmatpush3.bf16.msra.mxu1 %v528_v46 }
  0x9e   :  { %494 = vmatprep.subr.bf16.mxu1 %v735_v3 }
  0x9f   :  { %475 = vmatpush3.bf16.msra.mxu0 %v521_v22 }
  0xa1   :  { %495 = vmatpush3.bf16.msra.mxu1 %v529_v47 }
 0x10f   :  { %v118_v6 = vpop.xlane.xlu0 %117 }
 0x110   :  { %v121_v7 = vmul.f32 0.03125, %v118_v6 }
 0x112   :  { %v123_v8 = vsub.f32 %v879_v0, %v121_v7 }
 0x113   :  { %v120_v9 = vpop.xlane.xlu0 %119 }
 0x114   :  { %v122_v10 = vmul.f32 0.03125, %v120_v9  ;;  %v128_v11 = vsel %vm127_vm0, %v123_v8, 0.0 }
 0x115   :  { %v130_v12 = vmul.f32 %v128_v11, %v128_v11 }
 0x116   :  { %v124_v13 = vsub.f32 %v881_v1, %v122_v10 }
 0x117   :  { %132 = vadd.xlane.f32.xlu1 %v130_v12 }
 0x118   :  { %v129_v14 = vsel %vm127_vm0, %v124_v13, 0.0 }
 0x119   :  { %v131_v15 = vmul.f32 %v129_v14, %v129_v14 }
 0x11b   :  { %134 = vadd.xlane.f32.xlu1 %v131_v15 }
 0x1a4   :  { %v133_v25 = vpop.xlane.xlu1 %132 }
 0x1a5   :  { %v136_v26 = vmul.f32 0.03125, %v133_v25 }
 0x1a7   :  { %v138_v27 = vadd.f32 1e-06, %v136_v26 }
 0x1a8   :  { %v135_v28 = vpop.xlane.xlu1 %134 }
 0x1a9   :  { %530 = vrsqrt.f32 %v138_v27  ;;  %v137_v29 = vmul.f32 0.03125, %v135_v28 }
 0x1ab   :  { %v139_v30 = vadd.f32 1e-06, %v137_v29 }
 0x1ad   :  { %532 = vrsqrt.f32 %v139_v30 }
 0x1b3   :  { %v531_v31 = vpop.eup %530 }
 0x1b4   :  { %v142_v32 = vmul.f32 %v531_v31, %v128_v11 }
 0x1b6   :  { %v151_v36 = vmul.f32 %v422_v33, %v142_v32 }
 0x1b7   :  { %v533_v34 = vpop.eup %532 }
 0x1b8   :  { %v143_v35 = vmul.f32 %v533_v34, %v129_v14  ;;  %v160_v39 = vadd.f32 %v423_v37, %v151_v36 }
 0x1ba   :  { %v152_v38 = vmul.f32 %v422_v33, %v143_v35 }
 0x1bc   :  { %v161_v40 = vadd.f32 %v423_v37, %v152_v38 }
 0x1be   :  { %v162_v41 = vpack.c.bf16 %v161_v40, %v160_v39 }
 0x1c0   :  { %477 = vmatmul.mubr.bf16.vlgmr.msra.gmra.mrb[0].mxu0 %v162_v41 }
 0x293   :  { %v268_v49 = vpop.f32.mrb[0].mxu0 }
 0x294   :  { %v269_v50 = vadd.f32 %v424_v48, %v268_v49  ;;  %v478_v51 = vpop.f32.mrb[1].mxu0 }
 0x295   :  { %v271_v52 = vpop.f32.mrb[2].mxu0 }
 0x296   :  { %v277_v53 = vmul.f32 0.70710677, %v269_v50  ;;  %v272_v54 = vadd.f32 %v424_v48, %v271_v52  ;;  %v479_v55 = vpop.f32.mrb[3].mxu0  ;;  %v275_v60 = vmul.f32 0.5, %v269_v50 }
 0x298   :  { %534 = verf.f32 %v277_v53  ;;  %v278_v56 = vmul.f32 0.70710677, %v272_v54  ;;  %v276_v61 = vmul.f32 0.5, %v272_v54 }
 0x29a   :  { %536 = verf.f32 %v278_v56 }
 0x2a2   :  { %v535_v57 = vpop.eup %534 }
 0x2a3   :  { %v281_v58 = vadd.f32 1.0, %v535_v57 }
 0x2a4   :  { %v537_v59 = vpop.eup %536 }
 0x2a5   :  { %v282_v62 = vadd.f32 1.0, %v537_v59  ;;  %v283_v63 = vmul.f32 %v281_v58, %v275_v60 }
 0x2a7   :  { %v284_v2 = vmul.f32 %v282_v62, %v276_v61 }
 0x2a9   :  { %v285_v3 = vpack.c.bf16 %v284_v2, %v283_v63 }
 0x2ab   :  { %497 = vmatmul.mubr.bf16.vlgmr.msra.gmra.mrb[0].mxu1 %v285_v3 }
 0x37e   :  { %v391_v5 = vpop.f32.mrb[0].mxu1 }
 0x37f   :  { %v392_v6 = vadd.f32 %v433_v4, %v391_v5  ;;  %v498_v7 = vpop.f32.mrb[1].mxu1 }
 0x380   :  { %v394_v8 = vpop.f32.mrb[2].mxu1 }
 0x381   :  { %v398_v9 = vadd.f32 %v392_v6, %v879_v0  ;;  %v395_v10 = vadd.f32 %v433_v4, %v394_v8  ;;  %v499_v11 = vpop.f32.mrb[3].mxu1 }
 0x383   :  { %400 = vst [vmem:[#allocation14] sm:$0xff] %v398_v9  ;;  %v399_v12 = vadd.f32 %v395_v10, %v881_v1 }
 0x385   :  { %401 = vst [vmem:[#allocation14 + $0x8] sm:$0xff] %v399_v12 }
 0x386   :  { %703 = shalt.err (!%p700_p4)
}
 0x387   :  { %s704_s18 = scalar_lea.hbm %s929_s7, 256 }
 0x388   :  { %p705_p5 = scmp.ne.s32.totalorder %s929_s7, %s704_s18  ;;  %p708_p6 = scmp.lt.u32.totalorder %s704_s18, %s929_s7 }
 0x38a   :  { %p710_p7 = pnand %p708_p6, %p705_p5 }
 0x38c   :  { %713 = shalt.err (!%p710_p7)
}
 0x38d   :  { %413 = dma.vmem_to_hbm [thread:$0]  %s408_s8, 256, %s929_s7, [#allocation4], %s730_s5, %s730_s5, %s731_s1  }
 0x38e   :  { %722 = dma.done.wait [#allocation4], 256  }
 0x38f   :  { %723 = vsyncadd [#allocation4], 4294967040 }
 0x390   :  { %417 = vsyncpa [#allocation3], 1 }
 0x391   :  { %418 = vsyncpa [#allocation6], 1 }
 0x392   :  { %419 = vsyncpa [#allocation9], 1 }
 0x393   :  { %420 = vsyncpa [#allocation12], 1 }
 0x394   :  { %421 = vsyncpa [#allocation4], 1 }

</bundles_post_ra>
